<compile_context>
chip_gen: v7x
topology: tpu7x:2x2x1
jax: 0.10.0
libtpu: 0.0.40
codegen_flags: <defaults>
</compile_context>

<pallas_src>
import functools

import jax
import jax.numpy as jnp
from jax import lax
from jax.experimental import pallas as pl
from jax.experimental.pallas import tpu as pltpu


# ---------------------------------------------------------------------------
# Helpers
# ---------------------------------------------------------------------------
def _pick_lane_tile(hw, max_lanes=2048):
    """Largest divisor of `hw` that is a multiple of 128 (<= max_lanes); else hw.

    When no 128-multiple divides hw we use the full extent: a block dim equal to
    the full array dim is always legal (masked stores only in that rare case).
    """
    best = None
    for d in range(128, min(hw, max_lanes) + 1, 128):
        if hw % d == 0:
            best = d
    return best if best is not None else hw


# ---------------------------------------------------------------------------
# 1x1 Conv + folded BatchNorm (+ ReLU) as an MXU matmul, tiled over (N, HW).
# ---------------------------------------------------------------------------
def _make_pointwise_kernel(relu):
    def kernel(x_ref, w_ref, b_ref, o_ref):
        # bf16 MXU feed (no extra HBM traffic: cast happens in VMEM), f32 accumulate.
        x_bf = x_ref[...].astype(jnp.bfloat16)
        acc = jnp.dot(w_ref[...], x_bf, preferred_element_type=jnp.float32)
        acc = acc + b_ref[...]
        if relu:
            acc = jnp.maximum(acc, 0.0)
        o_ref[...] = acc.astype(o_ref.dtype)
    return kernel


@functools.partial(jax.jit, static_argnames=("relu", "take_channel_block"))
def pointwise_conv_bn(x, w, b, *, relu, take_channel_block=None):
    """1x1 conv with BatchNorm folded into (w, b), optional ReLU.  NCHW layout.

    If `take_channel_block` is an int, x has k*Cin channels and only channel block
    `take_channel_block` (size Cin) is read -- this fuses ChannelSplit into this
    kernel's in_spec (no split kernel, no extra HBM round trip).
    """
    N, Cx, H, W = x.shape
    Cout, Cin = w.shape
    HW = H * W
    cb = 0 if take_channel_block is None else int(take_channel_block)
    if take_channel_block is None:
        assert Cx == Cin
    else:
        assert Cx % Cin == 0 and cb < Cx // Cin

    Lt = _pick_lane_tile(HW)
    grid = (N, HW // Lt)
    w_bf = w.astype(jnp.bfloat16)   # tiny; keeps MXU bf16-native and halves w DMA

    out = pl.pallas_call(
        _make_pointwise_kernel(relu),
        out_shape=jax.ShapeDtypeStruct((N, Cout, HW), x.dtype),
        grid_spec=pltpu.PrefetchScalarGridSpec(
            num_scalar_prefetch=0,
            grid=grid,
            in_specs=[
                pl.BlockSpec((None, Cin, Lt), lambda n, t: (n, cb, t)),
                pl.BlockSpec((Cout, Cin), lambda n, t: (0, 0)),   # resident weights
                pl.BlockSpec((Cout, 1), lambda n, t: (0, 0)),     # resident bias
            ],
            out_specs=pl.BlockSpec((None, Cout, Lt), lambda n, t: (n, 0, t)),
        ),
        compiler_params=pltpu.CompilerParams(
            dimension_semantics=("parallel", "parallel")),
    )(x.reshape(N, Cx, HW), w_bf, b.reshape(Cout, 1))
    return out.reshape(N, Cout, H, W)


# ---------------------------------------------------------------------------
# Fused torch.cat([a, b], dim=1) + ChannelShuffle(groups).
# The permutation is done in-register (reshape/transpose -> XLU) and stored with
# one lane-dense full-block store -- no per-row masked copies.
# ---------------------------------------------------------------------------
def _make_concat_shuffle_kernel(ca, cb, groups):
    c = ca + cb
    cpg = c // groups

    def kernel(a_ref, b_ref, o_ref):
        cat = jnp.concatenate([a_ref[...], b_ref[...]], axis=0)        # (C, L)
        l = cat.shape[-1]
        # ChannelShuffle: out = cat.view(g, C/g, L).permute(1, 0, 2).view(C, L)
        o_ref[...] = cat.reshape(groups, cpg, l).transpose(1, 0, 2).reshape(c, l)
    return kernel


@functools.partial(jax.jit, static_argnames=("groups", "b_second_half"))
def concat_channel_shuffle(a, b, *, groups, b_second_half=False):
    """cat([a, b], dim=1) followed by ChannelShuffle(groups), NCHW.

    If `b_second_half` is True, `b` is the FULL input tensor and only its second
    channel half is read (ChannelSplit fused into this kernel's in_spec).
    """
    N, Ca, H, W = a.shape
    HW = H * W
    if b_second_half:
        Nb, Cb2, Hb, Wb = b.shape
        assert (N, H, W) == (Nb, Hb, Wb) and Cb2 % 2 == 0
        Cb = Cb2 // 2
        b_arr = b.reshape(N, Cb2, HW)
        b_block = 1                          # channel block 1 == second half
    else:
        Nb, Cb, Hb, Wb = b.shape
        assert (N, H, W) == (Nb, Hb, Wb)
        b_arr = b.reshape(N, Cb, HW)
        b_block = 0
    C = Ca + Cb
    assert C % groups == 0

    Lt = _pick_lane_tile(HW)
    grid = (N, HW // Lt)

    out = pl.pallas_call(
        _make_concat_shuffle_kernel(Ca, Cb, groups),
        out_shape=jax.ShapeDtypeStruct((N, C, HW), a.dtype),
        grid_spec=pltpu.PrefetchScalarGridSpec(
            num_scalar_prefetch=0,
            grid=grid,
            in_specs=[
                pl.BlockSpec((None, Ca, Lt), lambda n, t: (n, 0, t)),
                pl.BlockSpec((None, Cb, Lt), lambda n, t: (n, b_block, t)),
            ],
            out_specs=pl.BlockSpec((None, C, Lt), lambda n, t: (n, 0, t)),
        ),
        compiler_params=pltpu.CompilerParams(
            dimension_semantics=("parallel", "parallel")),
    )(a.reshape(N, Ca, HW), b_arr)
    return out.reshape(N, C, H, W)


# ---------------------------------------------------------------------------
# ChannelSplit fallback: both halves from ONE pallas_call (used only when
# C//2 is not a multiple of 8, so the fused BlockSpec read would be illegal).
# ---------------------------------------------------------------------------
def _split_both_kernel(x_ref, a_ref, b_ref):
    half = a_ref.shape[0]
    a_ref[...] = x_ref[pl.ds(0, half), :]
    b_ref[...] = x_ref[pl.ds(half, half), :]


@jax.jit
def channel_split_both(x):
    N, C, H, W = x.shape
    assert C % 2 == 0
    half = C // 2
    HW = H * W
    Lt = _pick_lane_tile(HW)
    grid = (N, HW // Lt)
    a, b = pl.pallas_call(
        _split_both_kernel,
        out_shape=(jax.ShapeDtypeStruct((N, half, HW), x.dtype),
                   jax.ShapeDtypeStruct((N, half, HW), x.dtype)),
        grid_spec=pltpu.PrefetchScalarGridSpec(
            num_scalar_prefetch=0,
            grid=grid,
            in_specs=[pl.BlockSpec((None, C, Lt), lambda n, t: (n, 0, t))],
            out_specs=(pl.BlockSpec((None, half, Lt), lambda n, t: (n, 0, t)),
                       pl.BlockSpec((None, half, Lt), lambda n, t: (n, 0, t))),
        ),
        compiler_params=pltpu.CompilerParams(
            dimension_semantics=("parallel", "parallel")),
    )(x.reshape(N, C, HW))
    return a.reshape(N, half, H, W), b.reshape(N, half, H, W)


# ---------------------------------------------------------------------------
# 3x3 grouped / strided conv + folded BN (kept on XLA).
# ---------------------------------------------------------------------------
def grouped_conv3x3_bn(x, w, b, *, stride, groups, relu=False):
    # TODO(synk): the 3x3 grouped/strided conv is left to XLA's conv_general_dilated
    # (no compact Pallas equivalent here); BatchNorm is folded into (w, b).
    y = lax.conv_general_dilated(
        x, w,
        window_strides=(stride, stride),
        padding=((1, 1), (1, 1)),
        dimension_numbers=("NCHW", "OIHW", "NCHW"),
        feature_group_count=groups,
    )
    y = y + b.reshape(1, -1, 1, 1)
    if relu:
        y = jnp.maximum(y, 0.0)
    return y


# ---------------------------------------------------------------------------
# Parameters (Conv + BatchNorm folded to inference-mode affine weights).
# ---------------------------------------------------------------------------
def _fold_bn(w, b, gamma, beta, mean, var, eps=1e-5):
    scale = gamma / jnp.sqrt(var + eps)
    w_f = w * scale.reshape((-1,) + (1,) * (w.ndim - 1))
    b_f = (b - mean) * scale + beta
    return w_f, b_f


def _conv_bn_params(key, cin, cout, ksize, groups=1):
    k = jax.random.split(key, 6)
    fan_in = (cin // groups) * ksize * ksize
    if ksize == 1:
        w_shape = (cout, cin)                       # consumed by the Pallas 1x1 kernel
    else:
        w_shape = (cout, cin // groups, ksize, ksize)
    w = jax.random.normal(k[0], w_shape, jnp.float32) / jnp.sqrt(fan_in)
    b = 0.1 * jax.random.normal(k[1], (cout,), jnp.float32)
    gamma = 1.0 + 0.1 * jax.random.normal(k[2], (cout,), jnp.float32)
    beta = 0.1 * jax.random.normal(k[3], (cout,), jnp.float32)
    mean = 0.1 * jax.random.normal(k[4], (cout,), jnp.float32)
    var = jax.random.uniform(k[5], (cout,), jnp.float32, minval=0.5, maxval=1.5)
    return _fold_bn(w, b, gamma, beta, mean, var)


def make_shuffle_block_params(key, inchannel, outchannel, *, groups, stride):
    ks = jax.random.split(key, 5)
    if stride > 1:
        oc = outchannel - inchannel
        assert oc == inchannel, "module's shortcut conv requires outchannel == 2*inchannel"
        return {
            "right": {
                "pw1": _conv_bn_params(ks[0], inchannel, oc, 1),
                "conv3": _conv_bn_params(ks[1], oc, oc, 3, groups),
                "pw2": _conv_bn_params(ks[2], oc, oc, 1),
            },
            "shortcut": {
                "conv3": _conv_bn_params(ks[3], oc, oc, 3, groups),
                "pw": _conv_bn_params(ks[4], oc, oc, 1),
            },
        }
    ic = outchannel // 2
    return {
        "right": {
            "pw1": _conv_bn_params(ks[0], ic, ic, 1),
            "conv3": _conv_bn_params(ks[1], ic, ic, 3, groups),
            "pw2": _conv_bn_params(ks[2], ic, ic, 1),
        }
    }


# ---------------------------------------------------------------------------
# shuffle_block forward (Pallas-backed) and a pure-JAX reference.
# ---------------------------------------------------------------------------
def shuffle_block_forward(params, x, *, stride, groups):
    def right(p, y, take_first_half=False):
        y = pointwise_conv_bn(y, *p["pw1"], relu=True,
                              take_channel_block=0 if take_first_half else None)
        y = grouped_conv3x3_bn(y, *p["conv3"], stride=stride, groups=groups)
        y = pointwise_conv_bn(y, *p["pw2"], relu=True)
        return y

    if stride > 1:
        out = right(params["right"], x)
        s = params["shortcut"]
        out1 = grouped_conv3x3_bn(x, *s["conv3"], stride=stride, groups=groups)
        out1 = pointwise_conv_bn(out1, *s["pw"], relu=True)
        return concat_channel_shuffle(out, out1, groups=groups)

    # stride == 1: identity shortcut on the second channel half.
    C = x.shape[1]
    half = C // 2
    if half % 8 == 0:
        # ChannelSplit fused into consumers' BlockSpecs -- no split kernel at all.
        out = right(params["right"], x, take_first_half=True)
        return concat_channel_shuffle(out, x, groups=groups, b_second_half=True)
    # Fallback for channel counts whose half is not 8-aligned (f32 sublane rule).
    x1, x2 = channel_split_both(x)
    out = right(params["right"], x1)
    return concat_channel_shuffle(out, x2, groups=groups)


def _ref_forward(params, x, *, stride, groups):
    def pw(p, y, relu):
        w, b = p
        z = jnp.einsum("oc,nchw->nohw", w, y) + b.reshape(1, -1, 1, 1)
        return jnp.maximum(z, 0.0) if relu else z

    def conv3(p, y):
        w, b = p
        z = lax.conv_general_dilated(
            y, w, (stride, stride), ((1, 1), (1, 1)),
            dimension_numbers=("NCHW", "OIHW", "NCHW"),
            feature_group_count=groups)
        return z + b.reshape(1, -1, 1, 1)

    def right(p, y):
        return pw(p["pw2"], conv3(p["conv3"], pw(p["pw1"], y, True)), True)

    if stride > 1:
        out = right(params["right"], x)
        s = params["shortcut"]
        out1 = pw(s["pw"], conv3(s["conv3"], x), True)
    else:
        half = x.shape[1] // 2
        out = right(params["right"], x[:, :half])
        out1 = x[:, half:]
    cat = jnp.concatenate([out, out1], axis=1)
    N, C, H, W = cat.shape
    return cat.reshape(N, groups, C // groups, H, W).transpose(0, 2, 1, 3, 4).reshape(N, C, H, W)


if __name__ == "__main__":
    key = jax.random.PRNGKey(0)
    kx, kp1, kp2 = jax.random.split(key, 3)

    # Small NCHW input consistent with a ShuffleNet v2 stage.
    x = jax.random.normal(kx, (2, 16, 16, 16), jnp.float32)
    N, C, H, W = x.shape
    half = C // 2
    ok = True

    # Standalone exact checks of the pure data-movement kernels.
    x1, x2 = channel_split_both(x)
    x1, x2 = jax.block_until_ready(x1), jax.block_until_ready(x2)
    ok &= bool(jnp.array_equal(x1, x[:, :half])) and bool(jnp.array_equal(x2, x[:, half:]))

    cs_ref = x.reshape(N, 2, C // 2, H, W).transpose(0, 2, 1, 3, 4).reshape(N, C, H, W)
    cs = jax.block_until_ready(concat_channel_shuffle(x1, x2, groups=2))
    ok &= bool(jnp.array_equal(cs, cs_ref))
    cs_f = jax.block_until_ready(
        concat_channel_shuffle(x1, x, groups=2, b_second_half=True))   # fused-split path
    ok &= bool(jnp.array_equal(cs_f, cs_ref))

    # Full shuffle_block forward, stride=1 (fused channel-split / identity branch).
    p1 = make_shuffle_block_params(kp1, 16, 16, groups=2, stride=1)
    y1 = jax.block_until_ready(shuffle_block_forward(p1, x, stride=1, groups=2))
    r1 = _ref_forward(p1, x, stride=1, groups=2)
    ok &= (y1.shape == r1.shape) and bool(jnp.allclose(y1, r1, atol=2e-2, rtol=2e-2))

    # Full shuffle_block forward, stride=2 (downsampling branch).
    p2 = make_shuffle_block_params(kp2, 16, 32, groups=2, stride=2)
    y2 = jax.block_until_ready(shuffle_block_forward(p2, x, stride=2, groups=2))
    r2 = _ref_forward(p2, x, stride=2, groups=2)
    ok &= (y2.shape == r2.shape) and bool(jnp.allclose(y2, r2, atol=2e-2, rtol=2e-2))

    if ok:
        print("KERNEL_OK")
    else:
        print("MISMATCH",
              float(jnp.max(jnp.abs(y1 - r1))),
              float(jnp.max(jnp.abs(y2 - r2))))
</pallas_src>

<mosaic_0001>
module attributes {stable_mosaic.version = 11 : i64} {
  func.func @_split_both_kernel(%arg0: i32, %arg1: i32, %arg2: memref<1x16x256xf32, #tpu.memory_space<vmem>>, %arg3: memref<1x8x256xf32, #tpu.memory_space<vmem>>, %arg4: memref<1x8x256xf32, #tpu.memory_space<vmem>>) attributes {dimension_semantics = [#tpu.dimension_semantics<parallel>, #tpu.dimension_semantics<parallel>], iteration_bounds = array<i64: 2, 1>, scalar_prefetch = 0 : i64, scratch_operands = 0 : i64, tpu.core_type = #tpu.core_type<tc>, window_params = [{transform_indices = @transform_0, window_bounds = array<i64: 1, 16, 256>}, {transform_indices = @transform_1, window_bounds = array<i64: 1, 8, 256>}, {transform_indices = @transform_2, window_bounds = array<i64: 1, 8, 256>}]} {
    %c0 = arith.constant 0 : index
    %c0_0 = arith.constant 0 : index
    %c0_1 = arith.constant 0 : index
    %0 = vector.load %arg2[%c0, %c0_0, %c0_1] : memref<1x16x256xf32, #tpu.memory_space<vmem>>, vector<1x8x256xf32>
    %1 = vector.shape_cast %0 : vector<1x8x256xf32> to vector<8x256xf32>
    %c0_2 = arith.constant 0 : index
    %c0_3 = arith.constant 0 : index
    %c0_4 = arith.constant 0 : index
    %2 = vector.load %arg3[%c0_2, %c0_3, %c0_4] : memref<1x8x256xf32, #tpu.memory_space<vmem>>, vector<1x8x256xf32>
    %3 = vector.shape_cast %2 : vector<1x8x256xf32> to vector<8x256xf32>
    %4 = vector.shape_cast %1 : vector<8x256xf32> to vector<1x8x256xf32>
    tpu.vector_store %arg3[%c0_2, %c0_3, %c0_4], %4 {strides = array<i32>} : memref<1x8x256xf32, #tpu.memory_space<vmem>>, vector<1x8x256xf32>,
    %c0_5 = arith.constant 0 : index
    %c8 = arith.constant 8 : index
    %c0_6 = arith.constant 0 : index
    %5 = vector.load %arg2[%c0_5, %c8, %c0_6] : memref<1x16x256xf32, #tpu.memory_space<vmem>>, vector<1x8x256xf32>
    %6 = vector.shape_cast %5 : vector<1x8x256xf32> to vector<8x256xf32>
    %c0_7 = arith.constant 0 : index
    %c0_8 = arith.constant 0 : index
    %c0_9 = arith.constant 0 : index
    %7 = vector.load %arg4[%c0_7, %c0_8, %c0_9] : memref<1x8x256xf32, #tpu.memory_space<vmem>>, vector<1x8x256xf32>
    %8 = vector.shape_cast %7 : vector<1x8x256xf32> to vector<8x256xf32>
    %9 = vector.shape_cast %6 : vector<8x256xf32> to vector<1x8x256xf32>
    tpu.vector_store %arg4[%c0_7, %c0_8, %c0_9], %9 {strides = array<i32>} : memref<1x8x256xf32, #tpu.memory_space<vmem>>, vector<1x8x256xf32>,
    return
  }
  func.func @transform_0(%arg0: i32, %arg1: i32) -> (i32, i32, i32) {
    %c0_i32 = arith.constant 0 : i32
    %c0_i32_0 = arith.constant 0 : i32
    return %arg0, %c0_i32, %arg1 : i32, i32, i32
  }
  func.func @transform_1(%arg0: i32, %arg1: i32) -> (i32, i32, i32) {
    %c0_i32 = arith.constant 0 : i32
    %c0_i32_0 = arith.constant 0 : i32
    return %arg0, %c0_i32, %arg1 : i32, i32, i32
  }
  func.func @transform_2(%arg0: i32, %arg1: i32) -> (i32, i32, i32) {
    %c0_i32 = arith.constant 0 : i32
    %c0_i32_0 = arith.constant 0 : i32
    return %arg0, %c0_i32, %arg1 : i32, i32, i32
  }
}

</mosaic_0001>

<bundles_post_ra>
// kernel: channel_split_both.1
= control target key start
LH: loop header
LB: loop body
LE: loop exit
PB: predicated region body
PF: predicated region fallthrough
CT: control target
= control target key end

     0   :  { %s431_s9 = smov 0   ;;  %s433_s10 = smov 0   ;;  %s455_s0 = inlined_call_operand.vmem [shape: f32[2,16,256], index: 0, kind: input, shape index: {}]   ;;  %s456_s1 = inlined_call_operand.vmem [shape: f32[2,8,256], index: 1, kind: output, shape index: {0}]   ;;  %s457_s2 = inlined_call_operand.vmem [shape: f32[2,8,256], index: 2, kind: output, shape index: {1}]  }
   0x1   :  { %s435_s11 = smov 0  }
   0x2 LB: > { %s25_s12 = sadd.s32 1, %s410_s10  ;;  %p356_p0 = scmp.ge.s32.totalorder %s414_s11, 1  ;;  %s414_s11 = sphi %s435_s11, %s13_s11   ;;  %s410_s10 = sphi %s433_s10, %s459_s10   ;;  %s406_s9 = sphi %s431_s9, %s458_s9  }
   0x3   : > { %p27_p1 = scmp.ge.s32.totalorder %s25_s12, 2  ;;  %p138_p2 = scmp.lt.s32.totalorder %s414_s11, 3 }
   0x5   : > { %s461_s12 = smov (%p27_p1, %s25_s12), 0  ;;  %p139_p3 = pnand %p356_p0, %p138_p2 }
   0x6   : > { %p178_p4 = scmp.lt.s32.totalorder (!%p139_p3), %s406_s9, 1 }
   0x7   : > { %142 = sbr.rel (%p139_p3) target bundleno = 20 (0x14), region = 24 }
   0xe   : > { %s463_s9 = smov (!%p178_p4, %s406_s9), 1 }
   0xf   : > { %s365_s13 = sshll.u32 %s463_s9, 5  ;;  %s366_s14 = sshll.u32 %s463_s9, 4 }
  0x10   : > { %s185_s17 = scalar_lea.vmem %s455_s0, %s365_s13  ;;  %s195_s20 = scalar_lea.vmem %s456_s1, %s366_s14 }
  0x11   : > { %v207_v0 = vld [vmem:[%s185_s17] sm:$0xff]  ;;  %v208_v1 = vld [vmem:[%s185_s17 + $0x8] sm:$0xff]  ;;  %s205_s23 = scalar_lea.vmem %s457_s2, %s366_s14  ;;  %v211_v2 = vld [vmem:[%s185_s17 + $0x10] sm:$0xff] }
  0x12   : > { %209 = vst [vmem:[%s195_s20] sm:$0xff] %v207_v0  ;;  %210 = vst [vmem:[%s195_s20 + $0x8] sm:$0xff] %v208_v1  ;;  %v212_v3 = vld [vmem:[%s185_s17 + $0x18] sm:$0xff] }
  0x13   : > { %213 = vst [vmem:[%s205_s23] sm:$0xff] %v211_v2  ;;  %214 = vst [vmem:[%s205_s23 + $0x8] sm:$0xff] %v212_v3 }
  0x14 PF: > { %s13_s11 = sadd.s32 1, %s414_s11   ;;  %s458_s9 = smov %s410_s10 }
  0x15   : > { %p10_p5 = scmp.ge.s32.totalorder %s13_s11, 4   ;;  %s459_s10 = smov %s461_s12 }
  0x17   :  { %12 = sbr.rel (!%p10_p5) target bundleno = 2 (0x2), region = 66 }

</bundles_post_ra>
